<compile_context>
chip_gen: v5e
topology: v5e:2x2
jax: 0.10.0
libtpu: 0.0.40
codegen_flags: <defaults>
</compile_context>

<pallas_src>
import functools

import jax
import jax.numpy as jnp
from jax import lax
from jax.experimental import pallas as pl
from jax.experimental.pallas import tpu as pltpu

LN_EPS = 1e-5  # torch.nn.LayerNorm default


def _activation(u, kind):
    if kind == "relu":
        return jnp.maximum(u, 0.0)
    elif kind == "gelu":
        # torch.nn.GELU() default = exact (erf) gelu
        return jax.nn.gelu(u, approximate=False)
    elif kind == "telu":
        return u * jnp.tanh(jnp.exp(u))
    raise ValueError(f"unknown activation {kind}")


def _layer_norm(v, gamma, beta):
    mu = jnp.mean(v, axis=-1, keepdims=True)
    c = v - mu
    var = jnp.mean(c * c, axis=-1, keepdims=True)
    return c * lax.rsqrt(var + LN_EPS) * gamma + beta


def _ff_kernel_fused(x_ref, w1_ref, b1_ref, w2_ref, b2_ref, g_ref, beta_ref,
                     o_ref, *, pre_lnorm, activation_function, matmul_dtype):
    """Single k-block path: W1/W2 VMEM-resident, no scratch round-trips.

    Grid = (row_blocks,).  Weight index_maps are constant so the weights are
    DMA'd from HBM once and reused for every row block.
    """
    gamma = g_ref[...].astype(jnp.float32)   # (1, d_model)
    beta = beta_ref[...].astype(jnp.float32)
    x = x_ref[...].astype(jnp.float32)

    h = _layer_norm(x, gamma, beta) if pre_lnorm else x
    u = jnp.dot(h.astype(matmul_dtype), w1_ref[...],
                preferred_element_type=jnp.float32)
    u = u + b1_ref[...].astype(jnp.float32)
    a = _activation(u, activation_function)
    y = jnp.dot(a.astype(matmul_dtype), w2_ref[...],
                preferred_element_type=jnp.float32)
    y = y + b2_ref[...].astype(jnp.float32)

    out = (y + x) if pre_lnorm else _layer_norm(x + y, gamma, beta)
    o_ref[...] = out.astype(o_ref.dtype)


def _ff_kernel_ktiled(x_ref, w1_ref, b1_ref, w2_ref, b2_ref, g_ref, beta_ref,
                      o_ref, h_ref, acc_ref, *,
                      pre_lnorm, activation_function, matmul_dtype):
    """Grid = (row_blocks, k_blocks); k tiles d_inner (reduction axis)."""
    k = pl.program_id(1)
    nk = pl.num_programs(1)

    gamma = g_ref[...].astype(jnp.float32)   # (1, d_model)
    beta = beta_ref[...].astype(jnp.float32)

    @pl.when(k == 0)
    def _init():
        x = x_ref[...].astype(jnp.float32)
        h = _layer_norm(x, gamma, beta) if pre_lnorm else x
        h_ref[...] = h.astype(matmul_dtype)   # MXU input dtype (bf16 default)

    # (row_tile, k_tile) slab of the hidden layer for this k block.
    u = jnp.dot(h_ref[...], w1_ref[...], preferred_element_type=jnp.float32)
    u = u + b1_ref[...].astype(jnp.float32)
    a = _activation(u, activation_function)
    contrib = jnp.dot(a.astype(matmul_dtype), w2_ref[...],
                      preferred_element_type=jnp.float32)

    # Conditional first-write: saves the zero-fill store + read-add on k==0.
    @pl.when(k == 0)
    def _first():
        acc_ref[...] = contrib

    @pl.when(k != 0)
    def _accum():
        acc_ref[...] += contrib

    @pl.when(k == nk - 1)
    def _finalize():
        x = x_ref[...].astype(jnp.float32)
        y = acc_ref[...] + b2_ref[...].astype(jnp.float32)
        out = (y + x) if pre_lnorm else _layer_norm(x + y, gamma, beta)
        o_ref[...] = out.astype(o_ref.dtype)


def _round_up(x, m):
    return (x + m - 1) // m * m


def _cdiv(a, b):
    return -(-a // b)


def _vmem_capacity_bytes():
    """Per-core VMEM capacity; conservative 64 MiB fallback (v7x-safe)."""
    try:
        return int(pltpu.get_tpu_info().vmem_capacity_bytes)
    except Exception:
        return 64 * 1024 * 1024


def _pick_k_tile(d_inner, d_model, mm_sz, weight_budget, requested):
    if requested is not None:
        if requested != d_inner:
            assert d_inner % requested == 0 and requested % 128 == 0, (
                "d_inner_tile must divide d_inner and be a multiple of 128")
        return requested
    # Keep full W1+W2 resident whenever the double-buffered weights fit the
    # generation-aware budget (single k block -> weights DMA'd once).
    if 4 * d_model * d_inner * mm_sz <= weight_budget:
        return d_inner
    # Otherwise tile d_inner; prefer 256-multiples (v6e/v7x MXU is 2x256^2),
    # fall back to 128 only when forced.
    for cand in (2048, 1536, 1024, 768, 512, 256, 128):
        if (cand < d_inner and d_inner % cand == 0
                and 4 * d_model * cand * mm_sz <= weight_budget):
            return cand
    return d_inner  # correctness fallback: single (oversized) block


def _estimate_vmem(row_tile, k_tile, d_model, d_inner, x_sz, mm_sz, single_k):
    est = (
        2 * row_tile * d_model * x_sz            # x block (double buffered)
        + 2 * row_tile * d_model * x_sz          # out block
        + 2 * d_model * k_tile * mm_sz           # W1 tile
        + 2 * k_tile * d_model * mm_sz           # W2 tile
        + 2 * (d_inner + 3 * d_model) * 4        # b1, b2, gamma, beta
        + 3 * row_tile * k_tile * 4              # u / a in-kernel temporaries
        + 3 * row_tile * d_model * 4             # x / y f32 temporaries
    )
    if not single_k:
        est += row_tile * d_model * (mm_sz + 4)  # h + f32 accumulator scratch
    return est


def positionwise_ff(inp, params, *, pre_lnorm, activation_function,
                    row_tile=512, d_inner_tile=None,
                    matmul_dtype=jnp.bfloat16):
    """inp: (seq_len, batch, d_model). Returns same shape/dtype.

    Passing a bf16 `inp` halves activation HBM traffic (kernel math stays f32).
    """
    seq_len, batch, d_model = inp.shape
    d_inner = params["w1"].shape[1]

    rows = seq_len * batch
    x2d = inp.reshape(rows, d_model)          # metadata-only, no HBM copy

    mm_sz = jnp.dtype(matmul_dtype).itemsize
    x_sz = inp.dtype.itemsize

    # Generation-aware VMEM budgets (v5e/v6e: 128 MiB, v7x: 64 MiB per core).
    vmem_cap = _vmem_capacity_bytes()
    usable = int(0.85 * vmem_cap)             # ~15% headroom
    weight_budget = int(0.45 * vmem_cap)      # weights allowed ~45% of VMEM

    k_tile = _pick_k_tile(d_inner, d_model, mm_sz, weight_budget, d_inner_tile)
    num_k_blocks = d_inner // k_tile
    single_k = num_k_blocks == 1

    # Row tile: multiple of 8, clamped for tiny inputs.  No host-side zero
    # padding; the partial last block is handled by Pallas (masked writes) and
    # all math is row-independent.
    if rows <= 8:
        row_tile = rows
    else:
        row_tile = max(8, _round_up(min(row_tile, _round_up(rows, 8)), 8))
        # Megacore: v7x has 2 TensorCores sharing the "parallel" row axis;
        # make sure there are >= 2 row blocks whenever the input allows it.
        if _cdiv(rows, row_tile) < 2:
            row_tile = max(8, _round_up(_cdiv(rows, 2), 8))
        # Shrink the row tile until the pipeline fits the per-core VMEM budget.
        while (row_tile > 8 and
               _estimate_vmem(row_tile, k_tile, d_model, d_inner,
                              x_sz, mm_sz, single_k) > usable):
            row_tile = max(8, _round_up(row_tile // 2, 8))
    num_row_blocks = _cdiv(rows, row_tile)

    est = _estimate_vmem(row_tile, k_tile, d_model, d_inner, x_sz, mm_sz,
                         single_k)
    vmem_limit = min(max(int(1.3 * est), 32 * 1024 * 1024), usable)

    # Feed the MXU in matmul_dtype (bf16 default) with f32 accumulation;
    # bf16 weights halve weight DMA bytes and VMEM footprint (important on
    # v7x's 64 MiB VMEM).  Biases / LN params stay f32.
    w1 = params["w1"].astype(matmul_dtype)
    w2 = params["w2"].astype(matmul_dtype)
    b1 = params["b1"].astype(jnp.float32)
    b2 = params["b2"].astype(jnp.float32)
    gamma = params["gamma"].astype(jnp.float32)
    beta = params["beta"].astype(jnp.float32)

    if single_k:
        # Common fast path: weights VMEM-resident (constant index_map -> one
        # HBM fetch for the whole kernel), no h/acc scratch round-trips.
        kernel = functools.partial(
            _ff_kernel_fused, pre_lnorm=pre_lnorm,
            activation_function=activation_function, matmul_dtype=matmul_dtype)
        grid = (num_row_blocks,)
        in_specs = [
            pl.BlockSpec((row_tile, d_model), lambda i: (i, 0)),   # x rows
            pl.BlockSpec((d_model, d_inner), lambda i: (0, 0)),    # W1 (resident)
            pl.BlockSpec((1, d_inner), lambda i: (0, 0)),          # b1
            pl.BlockSpec((d_inner, d_model), lambda i: (0, 0)),    # W2 (resident)
            pl.BlockSpec((1, d_model), lambda i: (0, 0)),          # b2
            pl.BlockSpec((1, d_model), lambda i: (0, 0)),          # gamma
            pl.BlockSpec((1, d_model), lambda i: (0, 0)),          # beta
        ]
        out_specs = pl.BlockSpec((row_tile, d_model), lambda i: (i, 0))
        scratch_shapes = []
        dim_sem = ("parallel",)
    else:
        kernel = functools.partial(
            _ff_kernel_ktiled, pre_lnorm=pre_lnorm,
            activation_function=activation_function, matmul_dtype=matmul_dtype)
        grid = (num_row_blocks, num_k_blocks)
        in_specs = [
            pl.BlockSpec((row_tile, d_model), lambda i, k: (i, 0)),  # x rows
            pl.BlockSpec((d_model, k_tile), lambda i, k: (0, k)),    # W1 tile
            pl.BlockSpec((1, k_tile), lambda i, k: (0, k)),          # b1 tile
            pl.BlockSpec((k_tile, d_model), lambda i, k: (k, 0)),    # W2 tile
            pl.BlockSpec((1, d_model), lambda i, k: (0, 0)),         # b2
            pl.BlockSpec((1, d_model), lambda i, k: (0, 0)),         # gamma
            pl.BlockSpec((1, d_model), lambda i, k: (0, 0)),         # beta
        ]
        out_specs = pl.BlockSpec((row_tile, d_model), lambda i, k: (i, 0))
        scratch_shapes = [
            pltpu.VMEM((row_tile, d_model), matmul_dtype),   # h = LN(x) or x
            pltpu.VMEM((row_tile, d_model), jnp.float32),    # f32 accumulator
        ]
        dim_sem = ("parallel", "arbitrary")

    out2d = pl.pallas_call(
        kernel,
        out_shape=jax.ShapeDtypeStruct((rows, d_model), inp.dtype),
        grid_spec=pltpu.PrefetchScalarGridSpec(
            num_scalar_prefetch=0,
            grid=grid,
            in_specs=in_specs,
            out_specs=out_specs,
            scratch_shapes=scratch_shapes,
        ),
        compiler_params=pltpu.CompilerParams(
            dimension_semantics=dim_sem,
            vmem_limit_bytes=vmem_limit),
    )(x2d, w1, b1, w2, b2, gamma, beta)

    return out2d.reshape(seq_len, batch, d_model)


def _reference(inp, params, *, pre_lnorm, activation_function):
    x = inp.astype(jnp.float32)

    def ln(v):
        mu = jnp.mean(v, axis=-1, keepdims=True)
        var = jnp.mean((v - mu) ** 2, axis=-1, keepdims=True)
        return (v - mu) / jnp.sqrt(var + LN_EPS) * params["gamma"][0] + params["beta"][0]

    def core(v):
        u = v @ params["w1"] + params["b1"][0]
        a = _activation(u, activation_function)
        return a @ params["w2"] + params["b2"][0]

    if pre_lnorm:
        out = core(ln(x)) + x
    else:
        out = ln(x + core(x))
    return out.astype(inp.dtype)


if __name__ == "__main__":
    def make_params(key, d_model, d_inner):
        k_w1, k_b1, k_w2, k_b2 = jax.random.split(key, 4)
        return {
            "w1": jax.random.normal(k_w1, (d_model, d_inner), jnp.float32) * (1.0 / d_model ** 0.5),
            "b1": jax.random.normal(k_b1, (1, d_inner), jnp.float32) * 0.01,
            "w2": jax.random.normal(k_w2, (d_inner, d_model), jnp.float32) * (1.0 / d_inner ** 0.5),
            "b2": jax.random.normal(k_b2, (1, d_model), jnp.float32) * 0.01,
            "gamma": jnp.ones((1, d_model), jnp.float32),
            "beta": jnp.zeros((1, d_model), jnp.float32),
        }

    def check(out, ref, atol, rtol, tag):
        assert out.shape == ref.shape and out.dtype == ref.dtype, tag
        a = out.astype(jnp.float32)
        b = ref.astype(jnp.float32)
        err = jnp.max(jnp.abs(a - b))
        assert jnp.allclose(a, b, atol=atol, rtol=rtol), \
            f"{tag}: max abs err {err}"

    key = jax.random.PRNGKey(0)
    k_inp, k_par, k_inp2 = jax.random.split(key, 3)

    # Small but lane-aligned shapes (d_model multiple of 128 -> dense stores).
    seq_len, batch, d_model, d_inner = 8, 2, 128, 256
    inp = jax.random.normal(k_inp, (seq_len, batch, d_model), jnp.float32)
    params = make_params(k_par, d_model, d_inner)

    # 1) default bf16 MXU path, post-LN, telu  (fused weight-resident kernel)
    out = jax.block_until_ready(positionwise_ff(
        inp, params, pre_lnorm=False, activation_function="telu"))
    ref = _reference(inp, params, pre_lnorm=False, activation_function="telu")
    check(out, ref, atol=1e-1, rtol=5e-2, tag="bf16 post-LN telu")

    # 2) default bf16 MXU path, pre-LN, telu  (fused weight-resident kernel)
    out = jax.block_until_ready(positionwise_ff(
        inp, params, pre_lnorm=True, activation_function="telu"))
    ref = _reference(inp, params, pre_lnorm=True, activation_function="telu")
    check(out, ref, atol=1e-1, rtol=5e-2, tag="bf16 pre-LN telu")

    # 3) f32 MXU path (tight tolerance), post-LN, telu  (fused kernel)
    out = jax.block_until_ready(positionwise_ff(
        inp, params, pre_lnorm=False, activation_function="telu",
        matmul_dtype=jnp.float32))
    ref = _reference(inp, params, pre_lnorm=False, activation_function="telu")
    check(out, ref, atol=1e-4, rtol=1e-4, tag="f32 post-LN telu")

    # 4) f32, pre-LN, d_inner split into 2 reduction steps (exercises the
    #    k-tiled accumulator kernel and its init/finalize pl.when path).
    out = jax.block_until_ready(positionwise_ff(
        inp, params, pre_lnorm=True, activation_function="telu",
        matmul_dtype=jnp.float32, d_inner_tile=128))
    ref = _reference(inp, params, pre_lnorm=True, activation_function="telu")
    check(out, ref, atol=1e-4, rtol=1e-4, tag="f32 pre-LN telu k-tiled")

    # 5) ragged row count (27 rows) — exercises the padding-free partial last
    #    row block (masked writes); relu activation.
    seq_len2, batch2 = 9, 3
    inp2 = jax.random.normal(k_inp2, (seq_len2, batch2, d_model), jnp.float32)
    out = jax.block_until_ready(positionwise_ff(
        inp2, params, pre_lnorm=False, activation_function="relu",
        matmul_dtype=jnp.float32))
    ref = _reference(inp2, params, pre_lnorm=False, activation_function="relu")
    check(out, ref, atol=1e-4, rtol=1e-4, tag="f32 ragged relu")

    print("KERNEL_OK")
</pallas_src>

<mosaic_0001>
module attributes {stable_mosaic.version = 11 : i64} {
  func.func @_ff_kernel_fused(%arg0: i32, %arg1: memref<8x128xf32, #tpu.memory_space<vmem>>, %arg2: memref<128x256xbf16, #tpu.memory_space<vmem>>, %arg3: memref<1x256xf32, #tpu.memory_space<vmem>>, %arg4: memref<256x128xbf16, #tpu.memory_space<vmem>>, %arg5: memref<1x128xf32, #tpu.memory_space<vmem>>, %arg6: memref<1x128xf32, #tpu.memory_space<vmem>>, %arg7: memref<1x128xf32, #tpu.memory_space<vmem>>, %arg8: memref<8x128xf32, #tpu.memory_space<vmem>>) attributes {dimension_semantics = [#tpu.dimension_semantics<parallel>], iteration_bounds = array<i64: 2>, scalar_prefetch = 0 : i64, scratch_operands = 0 : i64, tpu.core_type = #tpu.core_type<tc>, window_params = [{transform_indices = @transform_0, window_bounds = array<i64: 8, 128>}, {pipeline_mode = #tpu.pipeline_mode<synchronous>, transform_indices = @transform_1, window_bounds = array<i64: 128, 256>}, {pipeline_mode = #tpu.pipeline_mode<synchronous>, transform_indices = @transform_2, window_bounds = array<i64: 1, 256>}, {pipeline_mode = #tpu.pipeline_mode<synchronous>, transform_indices = @transform_3, window_bounds = array<i64: 256, 128>}, {pipeline_mode = #tpu.pipeline_mode<synchronous>, transform_indices = @transform_4, window_bounds = array<i64: 1, 128>}, {pipeline_mode = #tpu.pipeline_mode<synchronous>, transform_indices = @transform_5, window_bounds = array<i64: 1, 128>}, {pipeline_mode = #tpu.pipeline_mode<synchronous>, transform_indices = @transform_6, window_bounds = array<i64: 1, 128>}, {transform_indices = @transform_7, window_bounds = array<i64: 8, 128>}]} {
    %c0 = arith.constant 0 : index
    %c0_0 = arith.constant 0 : index
    %0 = vector.load %arg6[%c0, %c0_0] : memref<1x128xf32, #tpu.memory_space<vmem>>, vector<1x128xf32>
    %c0_1 = arith.constant 0 : index
    %c0_2 = arith.constant 0 : index
    %1 = vector.load %arg7[%c0_1, %c0_2] : memref<1x128xf32, #tpu.memory_space<vmem>>, vector<1x128xf32>
    %c0_3 = arith.constant 0 : index
    %c0_4 = arith.constant 0 : index
    %2 = vector.load %arg1[%c0_3, %c0_4] : memref<8x128xf32, #tpu.memory_space<vmem>>, vector<8x128xf32>
    %3 = arith.truncf %2 : vector<8x128xf32> to vector<8x128xbf16>
    %c0_5 = arith.constant 0 : index
    %c0_6 = arith.constant 0 : index
    %4 = vector.load %arg2[%c0_5, %c0_6] : memref<128x256xbf16, #tpu.memory_space<vmem>>, vector<128x256xbf16>
    %cst = arith.constant dense<0.000000e+00> : vector<8x256xf32>
    %5 = tpu.matmul %3, %4, %cst {dimension_numbers = #tpu.dot_dimension_numbers<[1], [0], [0], [1], [0, 0, 1, 1], [], []>} : vector<8x128xbf16>, vector<128x256xbf16>, vector<8x256xf32> -> vector<8x256xf32>
    %c0_7 = arith.constant 0 : index
    %c0_8 = arith.constant 0 : index
    %6 = vector.load %arg3[%c0_7, %c0_8] : memref<1x256xf32, #tpu.memory_space<vmem>>, vector<1x256xf32>
    %7 = vector.broadcast %6 : vector<1x256xf32> to vector<8x256xf32>
    %8 = arith.addf %5, %7 : vector<8x256xf32>
    %9 = math.exp %8 : vector<8x256xf32>
    %10 = math.tanh %9 : vector<8x256xf32>
    %11 = arith.mulf %8, %10 : vector<8x256xf32>
    %12 = arith.truncf %11 : vector<8x256xf32> to vector<8x256xbf16>
    %c0_9 = arith.constant 0 : index
    %c0_10 = arith.constant 0 : index
    %13 = vector.load %arg4[%c0_9, %c0_10] : memref<256x128xbf16, #tpu.memory_space<vmem>>, vector<256x128xbf16>
    %cst_11 = arith.constant dense<0.000000e+00> : vector<8x128xf32>
    %14 = tpu.matmul %12, %13, %cst_11 {dimension_numbers = #tpu.dot_dimension_numbers<[1], [0], [0], [1], [0, 0, 1, 1], [], []>} : vector<8x256xbf16>, vector<256x128xbf16>, vector<8x128xf32> -> vector<8x128xf32>
    %c0_12 = arith.constant 0 : index
    %c0_13 = arith.constant 0 : index
    %15 = vector.load %arg5[%c0_12, %c0_13] : memref<1x128xf32, #tpu.memory_space<vmem>>, vector<1x128xf32>
    %16 = vector.broadcast %15 : vector<1x128xf32> to vector<8x128xf32>
    %17 = arith.addf %14, %16 : vector<8x128xf32>
    %18 = arith.addf %2, %17 : vector<8x128xf32>
    %cst_14 = arith.constant dense<0.000000e+00> : vector<8xf32>
    %19 = vector.multi_reduction <add>, %18, %cst_14 [1] : vector<8x128xf32> to vector<8xf32>
    %20 = vector.shape_cast %19 : vector<8xf32> to vector<8x1xf32>
    %cst_15 = arith.constant 1.280000e+02 : f32
    %21 = vector.broadcast %cst_15 : f32 to vector<8x1xf32>
    %22 = arith.divf %20, %21 : vector<8x1xf32>
    %23 = vector.broadcast %22 : vector<8x1xf32> to vector<8x128xf32>
    %24 = arith.subf %18, %23 : vector<8x128xf32>
    %25 = arith.mulf %24, %24 : vector<8x128xf32>
    %cst_16 = arith.constant dense<0.000000e+00> : vector<8xf32>
    %26 = vector.multi_reduction <add>, %25, %cst_16 [1] : vector<8x128xf32> to vector<8xf32>
    %27 = vector.shape_cast %26 : vector<8xf32> to vector<8x1xf32>
    %cst_17 = arith.constant 1.280000e+02 : f32
    %28 = vector.broadcast %cst_17 : f32 to vector<8x1xf32>
    %29 = arith.divf %27, %28 : vector<8x1xf32>
    %cst_18 = arith.constant 9.99999974E-6 : f32
    %30 = vector.broadcast %cst_18 : f32 to vector<8x1xf32>
    %31 = arith.addf %29, %30 : vector<8x1xf32>
    %32 = math.rsqrt %31 : vector<8x1xf32>
    %33 = vector.broadcast %32 : vector<8x1xf32> to vector<8x128xf32>
    %34 = arith.mulf %24, %33 : vector<8x128xf32>
    %35 = vector.broadcast %0 : vector<1x128xf32> to vector<8x128xf32>
    %36 = arith.mulf %34, %35 : vector<8x128xf32>
    %37 = vector.broadcast %1 : vector<1x128xf32> to vector<8x128xf32>
    %38 = arith.addf %36, %37 : vector<8x128xf32>
    %c0_19 = arith.constant 0 : index
    %c0_20 = arith.constant 0 : index
    %39 = vector.load %arg8[%c0_19, %c0_20] : memref<8x128xf32, #tpu.memory_space<vmem>>, vector<8x128xf32>
    tpu.vector_store %arg8[%c0_19, %c0_20], %38 {strides = array<i32>} : memref<8x128xf32, #tpu.memory_space<vmem>>, vector<8x128xf32>,
    return
  }
  func.func @transform_0(%arg0: i32) -> (i32, i32) {
    %c0_i32 = arith.constant 0 : i32
    %c0_i32_0 = arith.constant 0 : i32
    return %arg0, %c0_i32 : i32, i32
  }
  func.func @transform_1(%arg0: i32) -> (i32, i32) {
    %c0_i32 = arith.constant 0 : i32
    %c0_i32_0 = arith.constant 0 : i32
    %c0_i32_1 = arith.constant 0 : i32
    return %c0_i32, %c0_i32_0 : i32, i32
  }
  func.func @transform_2(%arg0: i32) -> (i32, i32) {
    %c0_i32 = arith.constant 0 : i32
    %c0_i32_0 = arith.constant 0 : i32
    %c0_i32_1 = arith.constant 0 : i32
    return %c0_i32, %c0_i32_0 : i32, i32
  }
  func.func @transform_3(%arg0: i32) -> (i32, i32) {
    %c0_i32 = arith.constant 0 : i32
    %c0_i32_0 = arith.constant 0 : i32
    %c0_i32_1 = arith.constant 0 : i32
    return %c0_i32, %c0_i32_0 : i32, i32
  }
  func.func @transform_4(%arg0: i32) -> (i32, i32) {
    %c0_i32 = arith.constant 0 : i32
    %c0_i32_0 = arith.constant 0 : i32
    %c0_i32_1 = arith.constant 0 : i32
    return %c0_i32, %c0_i32_0 : i32, i32
  }
  func.func @transform_5(%arg0: i32) -> (i32, i32) {
    %c0_i32 = arith.constant 0 : i32
    %c0_i32_0 = arith.constant 0 : i32
    %c0_i32_1 = arith.constant 0 : i32
    return %c0_i32, %c0_i32_0 : i32, i32
  }
  func.func @transform_6(%arg0: i32) -> (i32, i32) {
    %c0_i32 = arith.constant 0 : i32
    %c0_i32_0 = arith.constant 0 : i32
    %c0_i32_1 = arith.constant 0 : i32
    return %c0_i32, %c0_i32_0 : i32, i32
  }
  func.func @transform_7(%arg0: i32) -> (i32, i32) {
    %c0_i32 = arith.constant 0 : i32
    %c0_i32_0 = arith.constant 0 : i32
    return %arg0, %c0_i32 : i32, i32
  }
}

</mosaic_0001>

<bundles_post_ra>
// kernel: tpu_custom_call.1
= control target key start
LH: loop header
LB: loop body
LE: loop exit
PB: predicated region body
PF: predicated region fallthrough
CT: control target
= control target key end

     0   :  { %s1487_s0 = inlined_call_operand.hbm [shape: f32[16,128], index: 0, kind: input, shape index: {}]   ;;  %s1488_s1 = inlined_call_operand.hbm [shape: bf16[128,256], index: 1, kind: input, shape index: {}]   ;;  %s1489_s2 = inlined_call_operand.hbm [shape: f32[1,256], index: 2, kind: input, shape index: {}]   ;;  %s1490_s3 = inlined_call_operand.hbm [shape: bf16[256,128], index: 3, kind: input, shape index: {}]   ;;  %s1491_s4 = inlined_call_operand.vmem [shape: f32[1,128], index: 4, kind: input, shape index: {}]   ;;  %s1492_s5 = inlined_call_operand.vmem [shape: f32[1,128], index: 5, kind: input, shape index: {}]   ;;  %s1493_s6 = inlined_call_operand.vmem [shape: f32[1,128], index: 6, kind: input, shape index: {}]   ;;  %s1494_s7 = inlined_call_operand.hbm [shape: f32[16,128], index: 7, kind: output, shape index: {}]  }
   0x1   :  { %1495 = sst [smem:[#allocation15_spill]] %s1488_s1 }
   0x2   :  { %12 = vsyncpa [#allocation3], 0 }
   0x3   :  { %14 = vsyncpa [#allocation3 + $0x1], 0 }
   0x4   :  { %15 = vsyncpa [#allocation6], 0 }
   0x5   :  { %16 = vsyncpa [#allocation9], 0 }
   0x6   :  { %17 = vsyncpa [#allocation4], 0 }
   0x7   :  { %19 = vsyncpa [#allocation4 + $0x1], 0  ;;  %s1315_s24 = smov 0   ;;  %s1317_s25 = smov 0  }
   0x8   :  { %s1319_s26 = smov 0   ;;  %s1321_s27 = smov 0  }
   0x9 LB: > { %s1496_s1 = sld [smem:[#allocation15_spill]]  ;;  %s1339_s8 = sadd.s32 4294967295, %s1265_s27   ;;  %s1265_s27 = sphi %s1321_s27, %s1507_s27   ;;  %s1261_s26 = sphi %s1319_s26, %s1506_s26   ;;  %s1257_s25 = sphi %s1317_s25, %s1505_s25   ;;  %s1253_s24 = sphi %s1315_s24, %s1504_s24  }
   0xa   : > { %p797_p0 = scmp.ge.s32.totalorder %s1265_s27, 1  ;;  %p46_p1 = scmp.eq.s32.totalorder %s1339_s8, 0 }
   0xb   : > { %p208_p2 = scmp.lt.s32.totalorder %s1265_s27, 3  ;;  %s1267_s10 = smov [#allocation5]  }
   0xc   : > { %s221_s11 = sshll.u32 %s1267_s10, 4  ;;  %s234_s14 = sshll.u32 %s1489_s2, 4  ;;  %s222_s11 = int_to_ptr.vmem [resolvable:$true] %s221_s11  ;;  %s235_s14 = int_to_ptr.hbm [resolvable:$true] %s234_s14 }
   0xd   : > { %p1344_p3 = pnand %p797_p0, %p208_p2  ;;  %s245_s18 = sshll.u32 %s1490_s3, 4  ;;  %s246_s18 = int_to_ptr.hbm [resolvable:$true] %s245_s18 }
   0xe   : > { %s1268_s19 = smov [#allocation7]   ;;  %s1269_s21 = smov 128  }
   0xf   : > { %s219_s30 = sshll.u32 %s1496_s1, 4  ;;  %p990_p4 = pneg %p1344_p3  ;;  %s220_s30 = int_to_ptr.hbm [resolvable:$true] %s219_s30 }
  0x10   : > { %s236_s20 = sshll.u32 %s1268_s19, 4  ;;  %s1270_s22 = smov 8   ;;  %s237_s20 = int_to_ptr.vmem [resolvable:$true] %s236_s20 }
  0x11   : > { %p1356_p6 = pnand %p990_p4, %p46_p1  ;;  %s1271_s23 = smov [#allocation8]  }
  0x12   : > { %s247_s28 = sshll.u32 %s1271_s23, 4  ;;  %s1272_s29 = smov 64   ;;  %s248_s28 = int_to_ptr.vmem [resolvable:$true] %s247_s28 }
  0x13   : > { %993 = dma.hbm_to_vmem [thread:$0]  (!%p1356_p6), %s220_s30, 2048, %s222_s11, [#allocation6], %s1269_s21, %s1269_s21, %s1270_s22  }
  0x14   : > { %996 = dma.hbm_to_vmem [thread:$0]  (!%p1356_p6), %s235_s14, 32, %s237_s20, [#allocation6]  }
  0x15   : > { %s1273_s10 = smov 4   ;;  %s796_s12 = sadd.s32 4294967294, %s1265_s27  }
  0x16   : > { %999 = dma.hbm_to_vmem [thread:$0]  (!%p1356_p6), %s246_s18, 2048, %s248_s28, [#allocation9], %s1272_s29, %s1272_s29, %s1273_s10  }
  0x17   : > { %s1371_s30 = sadd.s32 1, %s1265_s27   ;;  %s32_s11 = sadd.s32 1, %s1261_s26 }
  0x18   : > { %s29_s13 = ssub.s32 %s1265_s27, %s1371_s30  ;;  %p39_p7 = scmp.ne.s32.totalorder %s1261_s26, %s1257_s25 }
  0x19   : > { %p30_p8 = scmp.eq.s32.totalorder %s29_s13, 0  ;;  %p40_p9 = scmp.eq.s32.totalorder %s1265_s27, 0 }
  0x1a   : > { %p45_p10 = scmp.ne.s32.totalorder %s1257_s25, %s1253_s24  ;;  %p195_p11 = scmp.eq.s32.totalorder %s1339_s8, 1 }
  0x1b   : > { %s1383_s14 = scalar_select %p30_p8, %s1261_s26, %s32_s11  }
  0x1c   : > { %p1387_p12 = por %p46_p1, %p45_p10  ;;  %p1391_p13 = por %p195_p11, %p39_p7 }
  0x1d   : > { %p201_p0 = scmp.eq.s32.totalorder %s796_s12, 1  ;;  %p41_p2 = por %p40_p9, %p39_p7 }
  0x1e   : > { %s270_s17 = sand.u32 1, %s1261_s26   ;;  %p1011_p6 = scmp.lt.s32.totalorder %s1265_s27, 2 }
  0x1f   : > { %p1396_p4 = por %p201_p0, %p45_p10  ;;  %s802_s19 = sshll.u32 %s270_s17, 3 }
  0x20   : > { %s803_s20 = sshll.u32 %s1265_s27, 3  ;;  %s274_s29 = scalar_lea.vmem [#allocation2], %s802_s19 }
  0x21   : > { %s278_s23 = scalar_lea.hbm %s1487_s0, %s803_s20  ;;  %s282_s10 = sshll.u32 %s274_s29, 4  ;;  %s283_s10 = int_to_ptr.vmem [resolvable:$true] %s282_s10 }
  0x22   : > { %s280_s28 = sshll.u32 %s278_s23, 4  ;;  %p1405_p8 = pnand %p1011_p6, %p41_p2  ;;  %s281_s28 = int_to_ptr.hbm [resolvable:$true] %s280_s28 }
  0x23   : > { %s271_s11 = scalar_lea.sflag [#allocation3], %s270_s17  ;;  %s1161_s13 = sshra.s32 %s281_s28, 4  ;;  %s1162_s13 = int_to_ptr.hbm [resolvable:$true] %s1161_s13 }
  0x24   : > { %s1163_s1 = scalar_lea.hbm %s1162_s13, 8  ;;  %p1165_p9 = pneg %p1405_p8 }
  0x25   : > { %p1164_p7 = scmp.ne.s32.totalorder %s1162_s13, %s1163_s1  ;;  %s1168_s19 = scalar_lea.hbm %s1487_s0, 16 }
  0x26   : > { %p1169_p0 = scmp.lt.s32.totalorder %s1162_s13, %s1487_s0  ;;  %p1170_p2 = scmp.lt.s32.totalorder %s1168_s19, %s1163_s1 }
  0x27   : > { %p1166_p10 = pnand %p1165_p9, %p1164_p7 }
  0x28   : > { %p1171_p6 = por %p1170_p2, %p1169_p0 }
  0x29   : > { %p1167_p11 = pneg %p1166_p10 }
  0x2b   : > { %p1172_p5 = pnand %p1171_p6, %p1167_p11 }
  0x2d   : > { %1175 = shalt.err (!%p1172_p5)
}
  0x2e   : > { %1003 = dma.hbm_to_vmem [thread:$0]  (!%p1405_p8), %s281_s28, 128, %s283_s10, %s271_s11  }
  0x2f   : > { %291 = sbr.rel (%p1344_p3) target bundleno = 646 (0x286), region = 48  ;;  %s1422_s17 = sand.u32 (!%p1344_p3), 1, %s1257_s25  }
  0x30   : > { %s805_s29 = sshll.u32 (!%p1344_p3), %s1422_s17, 3  ;;  %s294_s20 = scalar_lea.sflag (!%p1344_p3), [#allocation3], %s1422_s17 }
  0x31   : > { %s1428_s1 = scalar_lea.vmem (!%p1344_p3), [#allocation2], %s805_s29 }
  0x34   : > { %1236 = dma.done.wait (%p1387_p12), %s294_s20, 128  }
  0x35   : > { %1238 = vsyncadd (%p1387_p12), %s294_s20, 4294967168 }
  0x36   : > { %1240 = dma.done.wait (%p46_p1), [#allocation6], 2080  }
  0x37   : > { %1242 = vsyncadd (%p46_p1), [#allocation6], 4294965216 }
  0x38   : > { %1244 = dma.done.wait (%p46_p1), [#allocation9], 2048  }
  0x39   : > { %1246 = vsyncadd (%p46_p1), [#allocation9], 4294965248  ;;  %v868_v0 = vld [vmem:[#allocation5 + $0x70] sm:$0xf]  ;;  %v957_v1 = vld [vmem:[#allocation5 + $0x74] sm:$0xf0] }
  0x3a   : > { %v956_v2 = vld [vmem:[#allocation5 + $0x74] sm:$0xf]  ;;  %v869_v3 = vor.u32 %v957_v1, %v868_v0  ;;  %v870_v4 = vld [vmem:[#allocation5 + $0x78] sm:$0xf0]  ;;  %v860_v5 = vld [vmem:[#allocation5 + $0x60] sm:$0xf] }
  0x3b   : > { %v955_v6 = vld [vmem:[#allocation5 + $0x64] sm:$0xf0]  ;;  %v873_v7 = vor.u32 %v956_v2, %v870_v4  ;;  %v954_v8 = vld [vmem:[#allocation5 + $0x64] sm:$0xf]  ;;  %v862_v9 = vld [vmem:[#allocation5 + $0x68] sm:$0xf0] }
  0x3c   : > { %450 = vmatpush.bf16.msra.mxu0 %v869_v3  ;;  %v861_v10 = vor.u32 %v955_v6, %v860_v5  ;;  %v865_v11 = vor.u32 %v954_v8, %v862_v9  ;;  %v852_v12 = vld [vmem:[#allocation5 + $0x50] sm:$0xf]  ;;  %v953_v13 = vld [vmem:[#allocation5 + $0x54] sm:$0xf0]  ;;  %v952_v14 = vld [vmem:[#allocation5 + $0x54] sm:$0xf] }
  0x3d   : > { %463 = vmatpush.bf16.msra.mxu1 %v873_v7  ;;  %v854_v15 = vld [vmem:[#allocation5 + $0x58] sm:$0xf0]  ;;  %v853_v16 = vor.u32 %v953_v13, %v852_v12  ;;  %v844_v18 = vld [vmem:[#allocation5 + $0x40] sm:$0xf]  ;;  %v951_v19 = vld [vmem:[#allocation5 + $0x44] sm:$0xf0] }
  0x3e   : > { %v857_v17 = vor.u32 %v952_v14, %v854_v15  ;;  %v950_v20 = vld [vmem:[#allocation5 + $0x44] sm:$0xf]  ;;  %v846_v21 = vld [vmem:[#allocation5 + $0x48] sm:$0xf0]  ;;  %v836_v22 = vld [vmem:[#allocation5 + $0x30] sm:$0xf]  ;;  %v845_v24 = vor.u32 %v951_v19, %v844_v18 }
  0x3f   : > { %v949_v23 = vld [vmem:[#allocation5 + $0x34] sm:$0xf0]  ;;  %v948_v25 = vld [vmem:[#allocation5 + $0x34] sm:$0xf]  ;;  %v849_v28 = vor.u32 %v950_v20, %v846_v21  ;;  %v838_v29 = vld [vmem:[#allocation5 + $0x38] sm:$0xf0] }
  0x40   : > { %451 = vmatpush.bf16.msra.mxu0 %v861_v10  ;;  %v965_v26 = vld [vmem:[#allocation8 + $0x38] sm:$0xff]  ;;  %v964_v30 = vld [vmem:[#allocation8 + $0x30] sm:$0xff]  ;;  %v837_v32 = vor.u32 %v949_v23, %v836_v22  ;;  %v841_v33 = vor.u32 %v948_v25, %v838_v29  ;;  %v947_v35 = vld [vmem:[#allocation5 + $0x24] sm:$0xf0]  ;;  %v1274_v29 = vmov 128.0   ;;  %s939_s28 = sshll.u32 %s1339_s8, 3 }
  0x41   : > { %464 = vmatpush.bf16.msra.mxu1 %v865_v11  ;;  %v973_v27 = vld [vmem:[#allocation8 + $0x78] sm:$0xff]  ;;  %618 = vmatpush.bf16.msra.mxu2 %v965_v26  ;;  %v972_v31 = vld [vmem:[#allocation8 + $0x70] sm:$0xff]  ;;  %v946_v36 = vld [vmem:[#allocation5 + $0x24] sm:$0xf]  ;;  %s692_s21 = scalar_lea.hbm %s1494_s7, %s939_s28  ;;  %s343_s8 = scalar_lea.vmem [#allocation10], %s805_s29 }
  0x42   : > { %631 = vmatpush.bf16.msra.mxu3 %v973_v27  ;;  %v828_v34 = vld [vmem:[#allocation5 + $0x20] sm:$0xf]  ;;  %v830_v37 = vld [vmem:[#allocation5 + $0x28] sm:$0xf0]  ;;  %v820_v40 = vld [vmem:[#allocation5 + $0x10] sm:$0xf] }
  0x43   : > { %v829_v38 = vor.u32 %v947_v35, %v828_v34  ;;  %v833_v39 = vor.u32 %v946_v36, %v830_v37  ;;  %v945_v41 = vld [vmem:[#allocation5 + $0x14] sm:$0xf0]  ;;  %v944_v42 = vld [vmem:[#allocation5 + $0x14] sm:$0xf]  ;;  %v822_v43 = vld [vmem:[#allocation5 + $0x18] sm:$0xf0] }
  0x44   : > { %452 = vmatpush.bf16.msra.mxu0 %v853_v16  ;;  %v821_v44 = vor.u32 %v945_v41, %v820_v40  ;;  %v825_v45 = vor.u32 %v944_v42, %v822_v43  ;;  %v812_v46 = vld [vmem:[#allocation5] sm:$0xf]  ;;  %v943_v47 = vld [vmem:[#allocation5 + $0x4] sm:$0xf0]  ;;  %v942_v48 = vld [vmem:[#allocation5 + $0x4] sm:$0xf] }
  0x45   : > { %465 = vmatpush.bf16.msra.mxu1 %v857_v17  ;;  %619 = vmatpush.bf16.msra.mxu2 %v964_v30  ;;  %v814_v49 = vld [vmem:[#allocation5 + $0x8] sm:$0xf0]  ;;  %v813_v50 = vor.u32 %v943_v47, %v812_v46  ;;  %v346_v51 = vld [vmem:[%s1428_s1] sm:$0xff]  ;;  %v962_v56 = vld [vmem:[#allocation8 + $0x20] sm:$0xff]  ;;  %s694_s23 = sshll.u32 %s343_s8, 4  ;;  %s696_s20 = sshll.u32 %s692_s21, 4  ;;  %s695_s23 = int_to_ptr.vmem [resolvable:$true] %s694_s23  ;;  %s697_s20 = int_to_ptr.hbm [resolvable:$true] %s696_s20 }
  0x46   : > { %632 = vmatpush.bf16.msra.mxu3 %v972_v31  ;;  %v817_v52 = vor.u32 %v942_v48, %v814_v49  ;;  %v347_v53 = vpack.c.bf16 %v346_v51, %v346_v51  ;;  %v963_v54 = vld [vmem:[#allocation8 + $0x28] sm:$0xff]  ;;  %v970_v57 = vld [vmem:[#allocation8 + $0x60] sm:$0xff]  ;;  %v961_v58 = vld [vmem:[#allocation8 + $0x18] sm:$0xff]  ;;  %s682_s1 = scalar_lea.sflag [#allocation4], %s1422_s17  ;;  %s1205_s9 = sshra.s32 %s697_s20, 4  ;;  %s1206_s9 = int_to_ptr.hbm [resolvable:$true] %s1205_s9 }
  0x47   : > { %v971_v55 = vld [vmem:[#allocation8 + $0x68] sm:$0xff]  ;;  %v969_v59 = vld [vmem:[#allocation8 + $0x58] sm:$0xff]  ;;  %v960_v60 = vld [vmem:[#allocation8 + $0x10] sm:$0xff]  ;;  %s1207_s15 = scalar_lea.hbm %s1206_s9, 8  ;;  %s1211_s12 = scalar_lea.hbm %s1494_s7, 16 }
  0x48   : > { %453 = vmatpush.bf16.msra.mxu0 %v845_v24  ;;  %v968_v61 = vld [vmem:[#allocation8 + $0x50] sm:$0xff]  ;;  %v959_v62 = vld [vmem:[#allocation8 + $0x8] sm:$0xff]  ;;  %v958_v0 = vld [vmem:[#allocation8] sm:$0xff]  ;;  %p1208_p1 = scmp.ne.s32.totalorder %s1206_s9, %s1207_s15  ;;  %p1212_p12 = scmp.lt.s32.totalorder %s1206_s9, %s1494_s7 }
  0x49   : > { %466 = vmatpush.bf16.msra.mxu1 %v849_v28  ;;  %620 = vmatpush.bf16.msra.mxu2 %v963_v54  ;;  %v967_v63 = vld [vmem:[#allocation8 + $0x48] sm:$0xff]  ;;  %v966_v1 = vld [vmem:[#allocation8 + $0x40] sm:$0xff]  ;;  %v364_v2 = vld [vmem:[#allocation7] sm:$0x3]  ;;  %p1213_p8 = scmp.lt.s32.totalorder %s1211_s12, %s1207_s15 }
  0x4a   : > { %633 = vmatpush.bf16.msra.mxu3 %v971_v55  ;;  %v366_v3 = vperm.slane %v364_v2, 0  ;;  %v367_v4 = vperm.slane %v364_v2, 1  ;;  %v1056_v21 = vld [vmem:[%s1491_s4] ss:$0 sm:$0xff]  ;;  %p1209_p3 = pnand %p1208_p1, %p1391_p13 }
  0x4b   : > { %v1057_v49 = vld [vmem:[%s1492_s5] ss:$0 sm:$0xff]  ;;  %p1214_p7 = por %p1213_p8, %p1212_p12 }
  0x4c   : > { %454 = vmatpush.bf16.msra.mxu0 %v837_v32  ;;  %p1210_p5 = pneg %p1209_p3 }
  0x4d   : > { %467 = vmatpush.bf16.msra.mxu1 %v841_v33  ;;  %621 = vmatpush.bf16.msra.mxu2 %v962_v56 }
  0x4e   : > { %634 = vmatpush.bf16.msra.mxu3 %v970_v57  ;;  %p1215_p9 = pnand %p1214_p7, %p1210_p5 }
  0x50   : > { %455 = vmatpush.bf16.msra.mxu0 %v829_v38 }
  0x51   : > { %468 = vmatpush.bf16.msra.mxu1 %v833_v39  ;;  %622 = vmatpush.bf16.msra.mxu2 %v961_v58 }
  0x52   : > { %635 = vmatpush.bf16.msra.mxu3 %v969_v59 }
  0x54   : > { %456 = vmatpush.bf16.msra.mxu0 %v821_v44 }
  0x55   : > { %469 = vmatpush.bf16.msra.mxu1 %v825_v45  ;;  %623 = vmatpush.bf16.msra.mxu2 %v960_v60 }
  0x56   : > { %636 = vmatpush.bf16.msra.mxu3 %v968_v61 }
  0x58   : > { %457 = vmatpush.bf16.msra.mxu0 %v813_v50 }
  0x59   : > { %470 = vmatpush.bf16.msra.mxu1 %v817_v52  ;;  %624 = vmatpush.bf16.msra.mxu2 %v959_v62  ;;  %v1058_v52 = vld [vmem:[%s1493_s6] ss:$0 sm:$0xff] }
  0x5a   : > { %637 = vmatpush.bf16.msra.mxu3 %v967_v63 }
  0x5b   : > { %458 = vmatmul.bf16.vlgmr.msra.gmra.mxu0 %v347_v53 }
  0x5c   : > { %471 = vmatmul.bf16.vlgmr.msra.gmra.mxu1 %v347_v53 }
  0x5d   : > { %625 = vmatpush.bf16.msra.mxu2 %v958_v0 }
  0x5e   : > { %638 = vmatpush.bf16.msra.mxu3 %v966_v1 }
  0xd8   : > { %v459_v5 = vpop.f32.mrf.mxu0 }
  0xd9   : > { %v460_v6 = vadd.f32 %v459_v5, %v366_v3  ;;  %v472_v7 = vpop.f32.mrf.mxu1 }
  0xda   : > { %v473_v8 = vadd.f32 %v472_v7, %v367_v4 }
  0xdb   : > { %v476_v9 = vmul.f32 1.442695, %v460_v6 }
  0xdc   : > { %v478_v10 = vmul.f32 1.442695, %v473_v8 }
  0xdd   : > { %1059 = vpow2.f32 %v476_v9 }
  0xde   : > { %1061 = vpow2.f32 %v478_v10 }
  0xe0   : > { %v461_v11 = vpop.f32.mrf.mxu0 }
  0xe1   : > { %v474_v12 = vpop.f32.mrf.mxu1 }
  0xe3   : > { %v1060_v13 = vpop.eup %1059 }
  0xe4   : > { %v1062_v14 = vpop.eup %1061  ;;  %1063 = vtanh.f32 %v1060_v13 }
  0xe5   : > { %1065 = vtanh.f32 %v1062_v14 }
  0xe6   : > { %1067 = vrcp.f32 %v1274_v29 }
  0xea   : > { %v1064_v15 = vpop.eup %1063 }
  0xeb   : > { %v1066_v16 = vpop.eup %1065  ;;  %v482_v17 = vmul.f32 %v1064_v15, %v460_v6 }
  0xec   : > { %v483_v18 = vmul.f32 %v1066_v16, %v473_v8  ;;  %v1068_v30 = vpop.eup %1067 }
  0xed   : > { %v484_v19 = vpack.c.bf16 %v482_v17, %v482_v17  ;;  %v648_v31 = vmul.f32 128.0, %v1068_v30  ;;  %vm652_vm0 = vweird.f32 %v1068_v30 }
  0xee   : > { %v485_v20 = vpack.c.bf16 %v483_v18, %v483_v18 }
  0xef   : > { %626 = vmatmul.bf16.vlgmr.msra.gmra.mxu2 %v484_v19  ;;  %v649_v32 = vsub.f32 1.0, %v648_v31 }
  0xf0   : > { %639 = vmatmul.bf16.vlgmr.msra.gmra.mxu3 %v485_v20 }
  0xf1   : > { %v650_v33 = vmul.f32 %v1068_v30, %v649_v32 }
  0xf3   : > { %v651_v34 = vadd.f32 %v1068_v30, %v650_v33 }
  0xf5   : > { %v653_v35 = vsel %vm652_vm0, %v1068_v30, %v651_v34 }
 0x172   : > { %v627_v22 = vpop.f32.mrf.mxu2 }
 0x173   : > { %v628_v23 = vadd.f32 %v1056_v21, %v627_v22  ;;  %v640_v24 = vpop.f32.mrf.mxu3 }
 0x175   : > { %v641_v25 = vadd.f32 %v640_v24, %v628_v23 }
 0x177   : > { %v644_v26 = vadd.f32 %v641_v25, %v346_v51 }
 0x179   : > { %645 = vadd.xlane.f32.xlu0 %v644_v26 }
 0x17a   : > { %v629_v27 = vpop.f32.mrf.mxu2 }
 0x17b   : > { %v642_v28 = vpop.f32.mrf.mxu3 }
 0x1ec   : > { %v646_v36 = vpop.xlane.xlu0 %645 }
 0x1ed   : > { %v654_v37 = vmul.f32 %v653_v35, %v646_v36 }
 0x1ef   : > { %v655_v38 = vsub.f32 %v644_v26, %v654_v37 }
 0x1f1   : > { %v656_v39 = vmul.f32 %v655_v38, %v655_v38 }
 0x1f3   : > { %657 = vadd.xlane.f32.xlu0 %v656_v39 }
 0x266   : > { %v658_v40 = vpop.xlane.xlu0 %657 }
 0x267   : > { %v659_v41 = vmul.f32 %v658_v40, %v653_v35 }
 0x269   : > { %v660_v42 = vadd.f32 1e-05, %v659_v41 }
 0x26b   : > { %1069 = vrsqrt.f32 %v660_v42  ;;  %vm667_vm2 = vweird.f32 %v660_v42 }
 0x271   : > { %v1070_v43 = vpop.eup %1069 }
 0x272   : > { %v662_v44 = vmul.f32 %v1070_v43, %v660_v42  ;;  %vm668_vm1 = vweird.f32 %v1070_v43 }
 0x273   : > { %vm669_vm3 = vmor %vm667_vm2, %vm668_vm1 }
 0x274   : > { %v663_v45 = vmul.f32 %v1070_v43, %v662_v44 }
 0x276   : > { %v664_v46 = vmul.f32 0.5, %v663_v45 }
 0x278   : > { %v665_v47 = vsub.f32 1.5, %v664_v46 }
 0x27a   : > { %v666_v48 = vmul.f32 %v1070_v43, %v665_v47 }
 0x27c   : > { %v670_v50 = vsel %vm669_vm3, %v1070_v43, %v666_v48 }
 0x27d   : > { %v671_v51 = vmul.f32 %v670_v50, %v655_v38 }
 0x27f   : > { %v675_v53 = vmul.f32 %v1057_v49, %v671_v51 }
 0x281   : > { %v679_v54 = vadd.f32 %v1058_v52, %v675_v53 }
 0x283   : > { %680 = vst [vmem:[%s343_s8] sm:$0xff] %v679_v54 }
 0x284   : > { %1218 = shalt.err (!%p1215_p9)
}
 0x285   : > { %988 = dma.vmem_to_hbm [thread:$0]  (%p1391_p13), %s695_s23, 128, %s697_s20, %s682_s1  }
 0x286 PF: > { %s708_s17 = sand.u32 1, %s1253_s24   ;;  %p1503_p10 = scmp.ge.s32.totalorder %s1265_s27, 2 }
 0x287   : > { %s709_s13 = scalar_lea.sflag [#allocation4], %s708_s17 }
 0x288   : > { %p1005_p11 = pnand %p1503_p10, %p1396_p4 }
 0x28a   : > { %p1006_p0 = pneg %p1005_p11 }
 0x28c   : > { %1248 = dma.done.wait (%p1006_p0), %s709_s13, 128  }
 0x28d   : > { %1250 = vsyncadd (%p1006_p0), %s709_s13, 4294967168  ;;  %p22_p2 = scmp.ge.s32.totalorder %s1371_s30, 4   ;;  %s1504_s24 = smov %s1257_s25 }
 0x28e   : > { %s1505_s25 = smov %s1261_s26  ;;  %s1506_s26 = smov %s1383_s14 }
 0x28f   : > { %s1507_s27 = smov %s1371_s30  ;;  %24 = sbr.rel (!%p22_p2) target bundleno = 9 (0x9), region = 105 }
 0x294   :  { %715 = vsyncpa [#allocation3], 1 }
 0x295   :  { %717 = vsyncpa [#allocation3 + $0x1], 1 }
 0x296   :  { %718 = vsyncpa [#allocation6], 1 }
 0x297   :  { %719 = vsyncpa [#allocation9], 1 }
 0x298   :  { %720 = vsyncpa [#allocation4], 1 }
 0x299   :  { %722 = vsyncpa [#allocation4 + $0x1], 1 }

</bundles_post_ra>
